<compile_context>
chip_gen: v7x
topology: tpu7x:2x2x1
jax: 0.10.0
libtpu: 0.0.40
codegen_flags: <defaults>
</compile_context>

<pallas_src>
import functools

import jax
import jax.numpy as jnp
from jax.experimental import pallas as pl
from jax.experimental.pallas import tpu as pltpu


# --------------------- Prologue: adjacency normalization (runs once) ---------
def adj_norm_kernel(adj_ref, a_ref, *, alpha):
    V = adj_ref.shape[0]
    row = jax.lax.broadcasted_iota(jnp.int32, (V, V), 0)
    col = jax.lax.broadcasted_iota(jnp.int32, (V, V), 1)
    eye = (row == col).astype(jnp.float32)
    adj = adj_ref[...].astype(jnp.float32) + eye          # adj + I
    d = jnp.sum(adj, axis=1, keepdims=True)               # d = adj.sum(1)
    # Row-normalize and fold in the (1 - alpha) propagation factor so the
    # per-tile hot loop is `alpha * x + dot(A_scaled, h)`.
    a_ref[...] = ((1.0 - alpha) * adj / d).astype(a_ref.dtype)


# --------------------- Fused propagation + 1x1-conv kernel -------------------
def prop_mlp_kernel(a_ref, w_ref, b_ref, x_ref, o_ref, *, gdep, alpha):
    # a_ref: (V, V)        (1-alpha) * row-normalized adjacency, VMEM-resident
    # w_ref: (c_out, c_in) SMEM,  b_ref: (c_out,) SMEM
    # x_ref: (c_in, V, TB) VMEM tile,  o_ref: (c_out, V, TB) VMEM tile
    a = a_ref[...]
    c_in = x_ref.shape[0]
    c_out = o_ref.shape[0]

    accs = [None] * c_out
    for c in range(c_in):                          # static unroll (small C)
        x_c = x_ref[c].astype(jnp.float32)         # (V, TB)
        h_c = x_c
        for _ in range(gdep):                      # static unroll (gdep small)
            h_c = alpha * x_c + jnp.dot(a, h_c,
                                        preferred_element_type=jnp.float32)
        for o in range(c_out):                     # 1x1 conv channel mix (VPU)
            contrib = h_c * w_ref[o, c]
            accs[o] = contrib if accs[o] is None else accs[o] + contrib
    for o in range(c_out):
        o_ref[o] = (accs[o] + b_ref[o]).astype(o_ref.dtype)


# --------------------------------- Wrapper -----------------------------------
def prop_forward(x, adj, w, b, *, gdep, alpha):
    """x: (N, c_in, V, L) NCHW; adj: (V, V); w: (c_out, c_in); b: (c_out,)."""
    N, C, V, L = x.shape
    c_out = w.shape[0]
    B = N * L

    # 1) normalize adjacency once (keeps the per-tile body MXU-only)
    a_norm = pl.pallas_call(
        functools.partial(adj_norm_kernel, alpha=float(alpha)),
        out_shape=jax.ShapeDtypeStruct((V, V), jnp.float32),
        in_specs=[pl.BlockSpec(memory_space=pltpu.MemorySpace.VMEM)],
        out_specs=pl.BlockSpec(memory_space=pltpu.MemorySpace.VMEM),
    )(adj)

    # 2) lane tile over B = N*L from a VMEM budget
    #    (double-buffered in/out tiles + f32 temporaries per channel)
    bytes_per_col = 4 * V * (2 * C + 3 * c_out + 2)
    budget = 16 * 1024 * 1024
    tile_cap = max(128, min(4096, (budget // bytes_per_col) // 128 * 128))
    if B <= tile_cap:
        tile_b, b_pad = B, B                    # full-extent block (always legal)
    else:
        tile_b = tile_cap                       # multiple of 128 -> lane-dense
        b_pad = pl.cdiv(B, tile_b) * tile_b

    # 3) single layout change in, single layout change out
    x3 = jnp.transpose(x, (1, 2, 0, 3)).reshape(C, V, B)      # (C, V, N*L)
    if b_pad != B:
        x3 = jnp.pad(x3, ((0, 0), (0, 0), (0, b_pad - B)))

    out3 = pl.pallas_call(
        functools.partial(prop_mlp_kernel, gdep=int(gdep), alpha=float(alpha)),
        out_shape=jax.ShapeDtypeStruct((c_out, V, b_pad), x.dtype),
        grid=(b_pad // tile_b,),
        in_specs=[
            pl.BlockSpec((V, V), lambda j: (0, 0)),             # A_norm resident
            pl.BlockSpec(memory_space=pltpu.MemorySpace.SMEM),  # W (scalar reads)
            pl.BlockSpec(memory_space=pltpu.MemorySpace.SMEM),  # bias
            pl.BlockSpec((C, V, tile_b), lambda j: (0, 0, j)),  # x tile
        ],
        out_specs=pl.BlockSpec((c_out, V, tile_b), lambda j: (0, 0, j)),
        compiler_params=pltpu.CompilerParams(
            dimension_semantics=("parallel",),
            vmem_limit_bytes=48 * 1024 * 1024),
    )(a_norm, w, b, x3)

    if b_pad != B:
        out3 = out3[:, :, :B]
    return jnp.transpose(out3.reshape(c_out, V, N, L), (2, 0, 1, 3))  # (N,c_out,V,L)


# ----------------------------- Pure-JAX reference ----------------------------
def prop_ref(x, adj, w, b, *, gdep, alpha):
    V = adj.shape[0]
    adjI = adj + jnp.eye(V, dtype=adj.dtype)
    d = adjI.sum(1)
    a = adjI / d[:, None]
    h = x
    for _ in range(gdep):
        h = alpha * x + (1.0 - alpha) * jnp.einsum('ncwl,vw->ncvl', h, a)
    return jnp.einsum('oc,ncvl->novl', w, h) + b[None, :, None, None]


if __name__ == "__main__":
    key = jax.random.PRNGKey(0)
    k1, k2, k3, k4 = jax.random.split(key, 4)

    # small shapes consistent with the module's forward
    N, c_in, c_out, V, L = 2, 4, 8, 16, 8
    gdep, alpha = 2, 0.05
    # NOTE: self.dropout is stored in __init__ but never applied in forward().

    x = jax.random.normal(k1, (N, c_in, V, L), jnp.float32)
    adj = jax.random.uniform(k2, (V, V), jnp.float32)
    # deterministic synthetic Conv2d(c_in, c_out, 1x1) parameters
    w = 0.1 * jax.random.normal(k3, (c_out, c_in), jnp.float32)
    b = 0.1 * jax.random.normal(k4, (c_out,), jnp.float32)

    out = prop_forward(x, adj, w, b, gdep=gdep, alpha=alpha)
    out = jax.block_until_ready(out)

    ref = prop_ref(x, adj, w, b, gdep=gdep, alpha=alpha)
    assert out.shape == (N, c_out, V, L)
    assert jnp.allclose(out, ref, atol=1e-4, rtol=1e-4), "mismatch vs reference"
    print("KERNEL_OK")
</pallas_src>

<mosaic_0001>
module attributes {stable_mosaic.version = 11 : i64} {
  func.func @adj_norm_kernel(%arg0: memref<16x16xf32, #tpu.memory_space<vmem>>, %arg1: memref<16x16xf32, #tpu.memory_space<vmem>>) attributes {dimension_semantics = [], scalar_prefetch = 0 : i64, scratch_operands = 0 : i64, tpu.core_type = #tpu.core_type<tc>} {
    %0 = tpu.iota {dimensions = array<i32: 0>} : vector<16x16xi32>
    %1 = tpu.iota {dimensions = array<i32: 1>} : vector<16x16xi32>
    %2 = arith.cmpi eq, %0, %1 : vector<16x16xi32>
    %3 = arith.extui %2 : vector<16x16xi1> to vector<16x16xi32>
    %4 = arith.sitofp %3 : vector<16x16xi32> to vector<16x16xf32>
    %c0 = arith.constant 0 : index
    %c0_0 = arith.constant 0 : index
    %5 = vector.load %arg0[%c0, %c0_0] : memref<16x16xf32, #tpu.memory_space<vmem>>, vector<16x16xf32>
    %6 = arith.addf %5, %4 : vector<16x16xf32>
    %cst = arith.constant dense<0.000000e+00> : vector<16xf32>
    %7 = vector.multi_reduction <add>, %6, %cst [1] : vector<16x16xf32> to vector<16xf32>
    %8 = vector.shape_cast %7 : vector<16xf32> to vector<16x1xf32>
    %cst_1 = arith.constant 0.949999988 : f32
    %9 = vector.broadcast %cst_1 : f32 to vector<16x16xf32>
    %10 = arith.mulf %9, %6 : vector<16x16xf32>
    %11 = vector.broadcast %8 : vector<16x1xf32> to vector<16x16xf32>
    %12 = arith.divf %10, %11 : vector<16x16xf32>
    %c0_2 = arith.constant 0 : index
    %c0_3 = arith.constant 0 : index
    %13 = vector.load %arg1[%c0_2, %c0_3] : memref<16x16xf32, #tpu.memory_space<vmem>>, vector<16x16xf32>
    tpu.vector_store %arg1[%c0_2, %c0_3], %12 {strides = array<i32>} : memref<16x16xf32, #tpu.memory_space<vmem>>, vector<16x16xf32>,
    return
  }
}

</mosaic_0001>

<bundles_post_ra>
// kernel: tpu_custom_call.1
= control target key start
LH: loop header
LB: loop body
LE: loop exit
PB: predicated region body
PF: predicated region fallthrough
CT: control target
= control target key end

     0   :  { %6 = vsyncpa [#allocation3], 0  ;;  %s178_s0 = inlined_call_operand.hbm [shape: f32[16,16], index: 0, kind: input, shape index: {}]   ;;  %s179_s1 = inlined_call_operand.hbm [shape: f32[16,16], index: 1, kind: output, shape index: {}]  }
   0x1   :  { %7 = vsyncpa [#allocation4], 0  ;;  %s129_s6 = smov [#allocation2]   ;;  %s81_s10 = scalar_lea.hbm %s178_s0, 256 }
   0x2   :  { %s13_s7 = sshll.u32 %s129_s6, 4  ;;  %p82_p0 = scmp.ne.s32.totalorder %s178_s0, %s81_s10  ;;  %s14_s7 = int_to_ptr.vmem [resolvable:$true] %s13_s7 }
   0x3   :  { %p85_p1 = scmp.lt.u32.totalorder %s81_s10, %s178_s0 }
   0x5   :  { %p87_p2 = pnand %p85_p1, %p82_p0 }
   0x7   :  { %90 = shalt.err (!%p87_p2)
}
   0x8   :  { %s91_s15 = scalar_lea.vmem %s14_s7, 256  ;;  %p96_p4 = scmp.lt.s32.totalorder %s14_s7, %s14_s7 }
   0x9   :  { %p92_p3 = scmp.ne.s32.totalorder %s14_s7, %s91_s15  ;;  %p97_p5 = scmp.lt.s32.totalorder %s91_s15, %s91_s15 }
   0xb   :  { %p98_p6 = por %p97_p5, %p96_p4 }
   0xd   :  { %p99_p7 = pnand %p98_p6, %p92_p3 }
   0xf   :  { %102 = shalt.err (!%p99_p7)
}
  0x10   :  { %s130_s16 = smov 128   ;;  %s131_s17 = smov 8  }
  0x11   :  { %19 = dma.hbm_to_vmem [thread:$0]  %s178_s0, 256, %s14_s7, [#allocation3], %s130_s16, %s130_s16, %s131_s17  }
  0x12   :  { %125 = dma.done.wait [#allocation3], 256  }
  0x13   :  { %126 = vsyncadd [#allocation3], 4294967040  ;;  %v23_v0 = vlaneseq  ;;  %v132_v4 = vmov 0.0   ;;  %v34_v6 = vld [vmem:[#allocation2] sm:$0xff]  ;;  %vm38_vm2 = vcmask 130048   ;;  %v35_v8 = vld [vmem:[#allocation2 + $0x8] sm:$0xff] }
  0x14   :  { %s133_s0 = smov [#allocation5]  }
  0x15   :  { %v24_v1 = vshrl.u32 %v23_v0, 7  ;;  %v27_v2 = vand.u32 127, %v23_v0  ;;  %s58_s20 = sshll.u32 %s133_s0, 4  ;;  %s59_s20 = int_to_ptr.vmem [resolvable:$true] %s58_s20 }
  0x16   :  { %s103_s21 = scalar_lea.vmem %s59_s20, 256  ;;  %p108_p9 = scmp.lt.s32.totalorder %s59_s20, %s59_s20 }
  0x17   :  { %vm28_vm0 = vcmp.eq.s32.totalorder %v24_v1, %v27_v2  ;;  %v25_v3 = vadd.s32 8, %v24_v1  ;;  %p104_p8 = scmp.ne.s32.totalorder %s59_s20, %s103_s21  ;;  %p109_p10 = scmp.lt.s32.totalorder %s103_s21, %s103_s21 }
  0x18   :  { %v70_v5 = vsel %vm28_vm0, 1.0, %v132_v4 }
  0x19   :  { %vm29_vm1 = vcmp.eq.s32.totalorder %v25_v3, %v27_v2  ;;  %v36_v9 = vadd.f32 %v70_v5, %v34_v6  ;;  %p110_p11 = por %p109_p10, %p108_p9 }
  0x1a   :  { %v71_v7 = vsel %vm29_vm1, 1.0, %v132_v4 }
  0x1b   :  { %v37_v10 = vadd.f32 %v71_v7, %v35_v8  ;;  %v39_v11 = vsel %vm38_vm2, %v36_v9, 0.0  ;;  %v45_v15 = vmul.f32 0.95, %v36_v9  ;;  %p111_p12 = pnand %p110_p11, %p104_p8 }
  0x1c   :  { %40 = vadd.xlane.f32.xlu0 %v39_v11 }
  0x1d   :  { %v42_v12 = vsel %vm38_vm2, %v37_v10, 0.0  ;;  %v46_v17 = vmul.f32 0.95, %v37_v10 }
  0x20   :  { %43 = vadd.xlane.f32.xlu0 %v42_v12 }
  0xa9   :  { %v41_v13 = vpop.xlane.xlu0 %40 }
  0xaa   :  { %77 = vrcp.f32 %v41_v13 }
  0xad   :  { %v44_v14 = vpop.xlane.xlu0 %43 }
  0xae   :  { %79 = vrcp.f32 %v44_v14 }
  0xb4   :  { %v78_v16 = vpop.eup %77 }
  0xb5   :  { %v48_v18 = vmul.f32 %v78_v16, %v45_v15 }
  0xb7   :  { %51 = vst.msk [vmem:[#allocation5] sm:$0xff] %vm38_vm2, %v48_v18 }
  0xb8   :  { %v80_v19 = vpop.eup %79 }
  0xb9   :  { %v50_v20 = vmul.f32 %v80_v19, %v46_v17 }
  0xbb   :  { %52 = vst.msk [vmem:[#allocation5 + $0x8] sm:$0xff] %vm38_vm2, %v50_v20 }
  0xbc   :  { %114 = shalt.err (!%p111_p12)
}
  0xbd   :  { %s115_s24 = scalar_lea.hbm %s179_s1, 256 }
  0xbe   :  { %p116_p13 = scmp.ne.s32.totalorder %s179_s1, %s115_s24  ;;  %p119_p0 = scmp.lt.u32.totalorder %s115_s24, %s179_s1 }
  0xc0   :  { %p121_p1 = pnand %p119_p0, %p116_p13 }
  0xc2   :  { %124 = shalt.err (!%p121_p1)
}
  0xc3   :  { %64 = dma.vmem_to_hbm [thread:$0]  %s59_s20, 256, %s179_s1, [#allocation4], %s130_s16, %s130_s16, %s131_s17  }
  0xc4   :  { %127 = dma.done.wait [#allocation4], 256  }
  0xc5   :  { %128 = vsyncadd [#allocation4], 4294967040 }
  0xc6   :  { %68 = vsyncpa [#allocation3], 1 }
  0xc7   :  { %69 = vsyncpa [#allocation4], 1 }

</bundles_post_ra>
